<compile_context>
chip_gen: v6e
topology: v6e:2x2x1
jax: 0.10.0
libtpu: 0.0.40
codegen_flags: <defaults>
</compile_context>

<pallas_src>
import jax
import jax.numpy as jnp
from jax.experimental import pallas as pl
from jax.experimental.pallas import tpu as pltpu

# ----- module-consistent sizes -----
VOCAB = 100          # output_dim (and embedding rows)
VPAD = 128           # vocab padded to one full lane width
EMB = 32             # embedding_dim
HID = 32             # hidden_dim
NLAYERS = 2          # nn.LSTM(num_layers=2)
BATCH = 8
PAD_INDEX = 0
DECODE_STEPS = 8     # T fused steps per pallas_call


def decoder_kernel(tok_ref, hid_in_ref, cell_in_ref, emb_ref,
                   w0x_ref, w0h_ref, b0_ref,
                   w1x_ref, w1h_ref, b1_ref,
                   wfc_ref, bfc_ref,
                   logits_ref, hid_out_ref, cell_out_ref,
                   h_scr, c_scr):
    """One decode step per grid iteration; weights + state resident in VMEM.

    Layouts:
      tok_ref   : [1, B, 1] int32      token ids for this step
      hid_in/cell_in : [L, B, H] f32   initial recurrent state (read at t==0)
      emb_ref   : [VPAD, E]  bf16      embedding table (rows >= VOCAB are 0)
      w0x/w1x   : [E|H, 4H]  bf16      W_ih.T   (gate order i,f,g,o)
      w0h/w1h   : [H,   4H]  bf16      W_hh.T
      b0/b1     : [1,   4H]  f32       b_ih + b_hh
      wfc_ref   : [H, VPAD]  bf16      fc_out weight.T, lane-padded (cols >= VOCAB = 0)
      bfc_ref   : [1, VPAD]  f32       fc_out bias, lane-padded
    Outputs:
      logits_ref   : [1, B, VPAD] f32  lane-dense padded logits for this step
      hid_out/cell_out : [L, B, H] f32 final state (written at t==T-1)
    Scratch:
      h_scr, c_scr : [L, B, H] f32     state carried across grid iterations
    """
    t = pl.program_id(0)
    n_steps = pl.num_programs(0)
    B = tok_ref.shape[1]
    vpad = emb_ref.shape[0]
    H = h_scr.shape[-1]

    @pl.when(t == 0)
    def _init():
        h_scr[...] = hid_in_ref[...]
        c_scr[...] = cell_in_ref[...]

    # ---- embedding lookup on the (otherwise idle) MXU: one-hot @ table ----
    tok = tok_ref[0]                                                  # [B, 1] int32
    col = jax.lax.broadcasted_iota(jnp.int32, (B, vpad), 1)
    onehot = (col == tok).astype(jnp.bfloat16)                        # exactly one vreg
    x = jnp.dot(onehot, emb_ref[...],
                preferred_element_type=jnp.float32).astype(jnp.bfloat16)   # [B, E]
    # dropout(embedded) is identity in eval mode.

    def lstm_cell(inp_bf16, h_prev, c_prev, wx_ref, wh_ref, b_ref):
        # two accumulated MXU dots (no concat), bf16 operands, f32 accumulation
        gates = (jnp.dot(inp_bf16, wx_ref[...], preferred_element_type=jnp.float32)
                 + jnp.dot(h_prev.astype(jnp.bfloat16), wh_ref[...],
                           preferred_element_type=jnp.float32)
                 + b_ref[...])                                        # [B, 4H] f32
        # two full-vreg EUP pushes instead of four quarter-width ones
        sig = jax.nn.sigmoid(gates)
        th = jnp.tanh(gates)
        i = sig[:, 0 * H:1 * H]
        f = sig[:, 1 * H:2 * H]
        g = th[:, 2 * H:3 * H]
        o = sig[:, 3 * H:4 * H]
        c_new = f * c_prev + i * g
        h_new = o * jnp.tanh(c_new)
        return h_new, c_new

    h0, c0 = lstm_cell(x, h_scr[0], c_scr[0], w0x_ref, w0h_ref, b0_ref)
    h1, c1 = lstm_cell(h0.astype(jnp.bfloat16), h_scr[1], c_scr[1],
                       w1x_ref, w1h_ref, b1_ref)

    # prediction = fc_out(output.squeeze(0)); lane-dense padded logits
    # (padded lanes carry exact zeros: zero weight columns + zero bias).
    logits_ref[0] = (jnp.dot(h1.astype(jnp.bfloat16), wfc_ref[...],
                             preferred_element_type=jnp.float32) + bfc_ref[...])

    # carry the recurrent state in VMEM scratch (never touches HBM between steps)
    h_scr[0] = h0
    h_scr[1] = h1
    c_scr[0] = c0
    c_scr[1] = c1

    @pl.when(t == n_steps - 1)
    def _finalize():
        hid_out_ref[...] = h_scr[...]
        cell_out_ref[...] = c_scr[...]


def make_params(key):
    """Parameters in their native PyTorch layout."""
    ks = jax.random.split(key, 10)
    f32 = jnp.float32
    return {
        # nn.Embedding.from_pretrained(embedding_matrix_en, padding_idx=pad_index)
        "embedding": jax.random.normal(ks[0], (VOCAB, EMB), f32).at[PAD_INDEX].set(0.0),
        # LSTM layer 0: W_ih (4H, E), W_hh (4H, H), b_ih + b_hh (4H,)
        "w_ih_l0": 0.1 * jax.random.normal(ks[1], (4 * HID, EMB), f32),
        "w_hh_l0": 0.1 * jax.random.normal(ks[2], (4 * HID, HID), f32),
        "b_l0":    0.1 * jax.random.normal(ks[3], (4 * HID,), f32),
        # LSTM layer 1: W_ih (4H, H), W_hh (4H, H)
        "w_ih_l1": 0.1 * jax.random.normal(ks[4], (4 * HID, HID), f32),
        "w_hh_l1": 0.1 * jax.random.normal(ks[5], (4 * HID, HID), f32),
        "b_l1":    0.1 * jax.random.normal(ks[6], (4 * HID,), f32),
        # fc_out: Linear(hidden_dim, output_dim)
        "w_fc":    0.1 * jax.random.normal(ks[7], (VOCAB, HID), f32),
        "b_fc":    0.1 * jax.random.normal(ks[8], (VOCAB,), f32),
    }


def prepare_params(params):
    """One-time weight prep (transpose / pad to 128 lanes / bf16 cast), hoisted
    out of the decode step."""
    f32, bf16 = jnp.float32, jnp.bfloat16
    emb = params["embedding"]                                            # [V, E]
    V, E = emb.shape
    H = params["w_hh_l0"].shape[1]
    emb_pad = jnp.zeros((VPAD, E), f32).at[:V].set(emb).astype(bf16)     # [128, E]
    wfc_pad = jnp.zeros((H, VPAD), f32).at[:, :V].set(params["w_fc"].T).astype(bf16)
    bfc_pad = jnp.zeros((1, VPAD), f32).at[0, :V].set(params["b_fc"])
    return {
        "emb": emb_pad,
        "w0x": params["w_ih_l0"].T.astype(bf16),     # [E, 4H]
        "w0h": params["w_hh_l0"].T.astype(bf16),     # [H, 4H]
        "b0":  params["b_l0"].reshape(1, -1).astype(f32),
        "w1x": params["w_ih_l1"].T.astype(bf16),     # [H, 4H]
        "w1h": params["w_hh_l1"].T.astype(bf16),     # [H, 4H]
        "b1":  params["b_l1"].reshape(1, -1).astype(f32),
        "wfc": wfc_pad,                              # [H, 128]
        "bfc": bfc_pad,                              # [1, 128]
    }


def _decode_impl(tokens, hidden, cell, prepped):
    """Fused T-step (teacher-forced) decode in a single pallas_call.

    tokens: [T, B] int32; hidden, cell: [NLAYERS, B, H] f32.
    Returns (padded logits [T, B, VPAD] f32, hidden, cell).
    """
    T, B = tokens.shape
    L, _, H = hidden.shape
    E = prepped["emb"].shape[1]
    vpad = prepped["wfc"].shape[1]
    tok3 = tokens.reshape(T, B, 1).astype(jnp.int32)

    const2 = lambda t: (0, 0)
    const3 = lambda t: (0, 0, 0)

    grid_spec = pltpu.PrefetchScalarGridSpec(
        num_scalar_prefetch=0,
        grid=(T,),
        in_specs=[
            pl.BlockSpec((1, B, 1), lambda t: (t, 0, 0)),     # per-step tokens
            pl.BlockSpec((L, B, H), const3),                  # initial hidden (resident)
            pl.BlockSpec((L, B, H), const3),                  # initial cell   (resident)
            pl.BlockSpec((vpad, E), const2),                  # embedding table (resident)
            pl.BlockSpec((E, 4 * H), const2),                 # w0x
            pl.BlockSpec((H, 4 * H), const2),                 # w0h
            pl.BlockSpec((1, 4 * H), const2),                 # b0
            pl.BlockSpec((H, 4 * H), const2),                 # w1x
            pl.BlockSpec((H, 4 * H), const2),                 # w1h
            pl.BlockSpec((1, 4 * H), const2),                 # b1
            pl.BlockSpec((H, vpad), const2),                  # wfc
            pl.BlockSpec((1, vpad), const2),                  # bfc
        ],
        out_specs=[
            pl.BlockSpec((1, B, vpad), lambda t: (t, 0, 0)),  # per-step padded logits
            pl.BlockSpec((L, B, H), const3),                  # final hidden
            pl.BlockSpec((L, B, H), const3),                  # final cell
        ],
        scratch_shapes=[
            pltpu.VMEM((L, B, H), jnp.float32),               # h carried across steps
            pltpu.VMEM((L, B, H), jnp.float32),               # c carried across steps
        ],
    )

    logits_pad, h_new, c_new = pl.pallas_call(
        decoder_kernel,
        grid_spec=grid_spec,
        out_shape=(
            jax.ShapeDtypeStruct((T, B, vpad), jnp.float32),
            jax.ShapeDtypeStruct((L, B, H), jnp.float32),
            jax.ShapeDtypeStruct((L, B, H), jnp.float32),
        ),
        compiler_params=pltpu.CompilerParams(
            dimension_semantics=("arbitrary",)),              # serial recurrence
    )(tok3, hidden, cell, prepped["emb"],
      prepped["w0x"], prepped["w0h"], prepped["b0"],
      prepped["w1x"], prepped["w1h"], prepped["b1"],
      prepped["wfc"], prepped["bfc"])
    return logits_pad, h_new, c_new


decoder_decode = jax.jit(_decode_impl)


@jax.jit
def decoder_forward(tokens, hidden, cell, prepped):
    """Single-step Decoder.forward(input, hidden, cell) semantics (eval mode).
    Returns lane-padded logits [B, VPAD]; padded lanes are exact zeros, so slice
    [:, :VOCAB] once downstream only if a tight shape is required."""
    logits_pad, h_new, c_new = _decode_impl(tokens[None, :], hidden, cell, prepped)
    return logits_pad[0], h_new, c_new


def _reference(tokens, hidden, cell, params):
    """Pure-JAX f32 reference mirroring torch semantics (eval mode, one step)."""
    x = jnp.take(params["embedding"], tokens, axis=0)

    def cell_fn(inp, h, c, wih, whh, b):
        g = inp @ wih.T + h @ whh.T + b
        H = h.shape[-1]
        i, f, gg, o = (jax.nn.sigmoid(g[:, :H]), jax.nn.sigmoid(g[:, H:2 * H]),
                       jnp.tanh(g[:, 2 * H:3 * H]), jax.nn.sigmoid(g[:, 3 * H:]))
        c_new = f * c + i * gg
        return o * jnp.tanh(c_new), c_new

    h0, c0 = cell_fn(x, hidden[0], cell[0],
                     params["w_ih_l0"], params["w_hh_l0"], params["b_l0"])
    h1, c1 = cell_fn(h0, hidden[1], cell[1],
                     params["w_ih_l1"], params["w_hh_l1"], params["b_l1"])
    pred = h1 @ params["w_fc"].T + params["b_fc"]
    return pred, jnp.stack([h0, h1]), jnp.stack([c0, c1])


if __name__ == "__main__":
    key = jax.random.PRNGKey(0)
    kp, kt, kh, kc = jax.random.split(key, 4)

    params = make_params(kp)
    prepped = prepare_params(params)            # one-time weight prep (hoisted)

    tokens = jax.random.randint(kt, (DECODE_STEPS, BATCH), 0, VOCAB, dtype=jnp.int32)
    hidden = jax.random.normal(kh, (NLAYERS, BATCH, HID), jnp.float32)
    cell = jax.random.normal(kc, (NLAYERS, BATCH, HID), jnp.float32)

    # fused multi-step decode (one pallas_call for all DECODE_STEPS steps)
    logits_pad, h_new, c_new = decoder_decode(tokens, hidden, cell, prepped)
    jax.block_until_ready((logits_pad, h_new, c_new))

    # single-step wrapper preserving the module's forward(input, hidden, cell)
    pred1_pad, h1s, c1s = decoder_forward(tokens[0], hidden, cell, prepped)
    jax.block_until_ready(pred1_pad)

    # ---- correctness vs. pure-f32 reference (bf16 MXU operands -> loosened atol) ----
    h_ref, c_ref = hidden, cell
    preds = []
    for t in range(DECODE_STEPS):
        p, h_ref, c_ref = _reference(tokens[t], h_ref, c_ref, params)
        preds.append(p)
    preds = jnp.stack(preds)                                    # [T, B, VOCAB]

    assert logits_pad.shape == (DECODE_STEPS, BATCH, VPAD)
    assert jnp.allclose(logits_pad[:, :, :VOCAB], preds, atol=5e-2), "prediction mismatch"
    assert jnp.allclose(h_new, h_ref, atol=5e-2), "hidden mismatch"
    assert jnp.allclose(c_new, c_ref, atol=5e-2), "cell mismatch"

    p0, h0r, c0r = _reference(tokens[0], hidden, cell, params)
    assert jnp.allclose(pred1_pad[:, :VOCAB], p0, atol=5e-2), "single-step prediction mismatch"
    assert jnp.allclose(h1s, h0r, atol=5e-2), "single-step hidden mismatch"
    assert jnp.allclose(c1s, c0r, atol=5e-2), "single-step cell mismatch"

    print("KERNEL_OK")
</pallas_src>

<mosaic_0001>
module attributes {stable_mosaic.version = 11 : i64} {
  func.func @decoder_kernel(%arg0: i32, %arg1: memref<1x8x1xi32, #tpu.memory_space<vmem>>, %arg2: memref<2x8x32xf32, #tpu.memory_space<vmem>>, %arg3: memref<2x8x32xf32, #tpu.memory_space<vmem>>, %arg4: memref<128x32xbf16, #tpu.memory_space<vmem>>, %arg5: memref<32x128xbf16, #tpu.memory_space<vmem>>, %arg6: memref<32x128xbf16, #tpu.memory_space<vmem>>, %arg7: memref<1x128xf32, #tpu.memory_space<vmem>>, %arg8: memref<32x128xbf16, #tpu.memory_space<vmem>>, %arg9: memref<32x128xbf16, #tpu.memory_space<vmem>>, %arg10: memref<1x128xf32, #tpu.memory_space<vmem>>, %arg11: memref<32x128xbf16, #tpu.memory_space<vmem>>, %arg12: memref<1x128xf32, #tpu.memory_space<vmem>>, %arg13: memref<1x8x128xf32, #tpu.memory_space<vmem>>, %arg14: memref<2x8x32xf32, #tpu.memory_space<vmem>>, %arg15: memref<2x8x32xf32, #tpu.memory_space<vmem>>, %arg16: memref<2x8x32xf32, #tpu.memory_space<vmem>>, %arg17: memref<2x8x32xf32, #tpu.memory_space<vmem>>) attributes {dimension_semantics = [#tpu.dimension_semantics<arbitrary>], iteration_bounds = array<i64: 8>, scalar_prefetch = 0 : i64, scratch_operands = 2 : i64, tpu.core_type = #tpu.core_type<tc>, window_params = [{transform_indices = @transform_0, window_bounds = array<i64: 1, 8, 1>}, {pipeline_mode = #tpu.pipeline_mode<synchronous>, transform_indices = @transform_1, window_bounds = array<i64: 2, 8, 32>}, {pipeline_mode = #tpu.pipeline_mode<synchronous>, transform_indices = @transform_2, window_bounds = array<i64: 2, 8, 32>}, {pipeline_mode = #tpu.pipeline_mode<synchronous>, transform_indices = @transform_3, window_bounds = array<i64: 128, 32>}, {pipeline_mode = #tpu.pipeline_mode<synchronous>, transform_indices = @transform_4, window_bounds = array<i64: 32, 128>}, {pipeline_mode = #tpu.pipeline_mode<synchronous>, transform_indices = @transform_5, window_bounds = array<i64: 32, 128>}, {pipeline_mode = #tpu.pipeline_mode<synchronous>, transform_indices = @transform_6, window_bounds = array<i64: 1, 128>}, {pipeline_mode = #tpu.pipeline_mode<synchronous>, transform_indices = @transform_7, window_bounds = array<i64: 32, 128>}, {pipeline_mode = #tpu.pipeline_mode<synchronous>, transform_indices = @transform_8, window_bounds = array<i64: 32, 128>}, {pipeline_mode = #tpu.pipeline_mode<synchronous>, transform_indices = @transform_9, window_bounds = array<i64: 1, 128>}, {pipeline_mode = #tpu.pipeline_mode<synchronous>, transform_indices = @transform_10, window_bounds = array<i64: 32, 128>}, {pipeline_mode = #tpu.pipeline_mode<synchronous>, transform_indices = @transform_11, window_bounds = array<i64: 1, 128>}, {transform_indices = @transform_12, window_bounds = array<i64: 1, 8, 128>}, {pipeline_mode = #tpu.pipeline_mode<synchronous>, transform_indices = @transform_13, window_bounds = array<i64: 2, 8, 32>}, {pipeline_mode = #tpu.pipeline_mode<synchronous>, transform_indices = @transform_14, window_bounds = array<i64: 2, 8, 32>}]} {
    %c0_i32 = arith.constant 0 : i32
    %0 = arith.cmpi eq, %arg0, %c0_i32 : i32
    %1 = arith.extui %0 : i1 to i32
    %c0_i32_0 = arith.constant 0 : i32
    %2 = arith.cmpi ne, %1, %c0_i32_0 : i32
    scf.if %2 {
      %c0_55 = arith.constant 0 : index
      %c0_56 = arith.constant 0 : index
      %c0_57 = arith.constant 0 : index
      %95 = vector.load %arg2[%c0_55, %c0_56, %c0_57] : memref<2x8x32xf32, #tpu.memory_space<vmem>>, vector<2x8x32xf32>
      %c0_58 = arith.constant 0 : index
      %c0_59 = arith.constant 0 : index
      %c0_60 = arith.constant 0 : index
      %96 = vector.load %arg16[%c0_58, %c0_59, %c0_60] : memref<2x8x32xf32, #tpu.memory_space<vmem>>, vector<2x8x32xf32>
      tpu.vector_store %arg16[%c0_58, %c0_59, %c0_60], %95 {strides = array<i32>} : memref<2x8x32xf32, #tpu.memory_space<vmem>>, vector<2x8x32xf32>,
      %c0_61 = arith.constant 0 : index
      %c0_62 = arith.constant 0 : index
      %c0_63 = arith.constant 0 : index
      %97 = vector.load %arg3[%c0_61, %c0_62, %c0_63] : memref<2x8x32xf32, #tpu.memory_space<vmem>>, vector<2x8x32xf32>
      %c0_64 = arith.constant 0 : index
      %c0_65 = arith.constant 0 : index
      %c0_66 = arith.constant 0 : index
      %98 = vector.load %arg17[%c0_64, %c0_65, %c0_66] : memref<2x8x32xf32, #tpu.memory_space<vmem>>, vector<2x8x32xf32>
      tpu.vector_store %arg17[%c0_64, %c0_65, %c0_66], %97 {strides = array<i32>} : memref<2x8x32xf32, #tpu.memory_space<vmem>>, vector<2x8x32xf32>,
    } else {
    }
    %c0 = arith.constant 0 : index
    %c0_1 = arith.constant 0 : index
    %c0_2 = arith.constant 0 : index
    %3 = vector.load %arg1[%c0, %c0_1, %c0_2] : memref<1x8x1xi32, #tpu.memory_space<vmem>>, vector<1x8x1xi32>
    %4 = vector.shape_cast %3 : vector<1x8x1xi32> to vector<8x1xi32>
    %5 = tpu.iota {dimensions = array<i32: 1>} : vector<8x128xi32>
    %6 = vector.broadcast %4 : vector<8x1xi32> to vector<8x128xi32>
    %7 = arith.cmpi eq, %5, %6 : vector<8x128xi32>
    %8 = arith.extui %7 : vector<8x128xi1> to vector<8x128xi32>
    %9 = arith.sitofp %8 : vector<8x128xi32> to vector<8x128xf32>
    %10 = arith.truncf %9 : vector<8x128xf32> to vector<8x128xbf16>
    %c0_3 = arith.constant 0 : index
    %c0_4 = arith.constant 0 : index
    %11 = vector.load %arg4[%c0_3, %c0_4] : memref<128x32xbf16, #tpu.memory_space<vmem>>, vector<128x32xbf16>
    %cst = arith.constant dense<0.000000e+00> : vector<8x32xf32>
    %12 = tpu.matmul %10, %11, %cst {dimension_numbers = #tpu.dot_dimension_numbers<[1], [0], [0], [1], [0, 0, 1, 1], [], []>} : vector<8x128xbf16>, vector<128x32xbf16>, vector<8x32xf32> -> vector<8x32xf32>
    %13 = arith.truncf %12 : vector<8x32xf32> to vector<8x32xbf16>
    %c0_5 = arith.constant 0 : index
    %c0_6 = arith.constant 0 : index
    %c0_7 = arith.constant 0 : index
    %14 = vector.load %arg16[%c0_5, %c0_6, %c0_7] : memref<2x8x32xf32, #tpu.memory_space<vmem>>, vector<1x8x32xf32>
    %15 = vector.shape_cast %14 : vector<1x8x32xf32> to vector<8x32xf32>
    %c0_8 = arith.constant 0 : index
    %c0_9 = arith.constant 0 : index
    %c0_10 = arith.constant 0 : index
    %16 = vector.load %arg17[%c0_8, %c0_9, %c0_10] : memref<2x8x32xf32, #tpu.memory_space<vmem>>, vector<1x8x32xf32>
    %17 = vector.shape_cast %16 : vector<1x8x32xf32> to vector<8x32xf32>
    %c0_11 = arith.constant 0 : index
    %c0_12 = arith.constant 0 : index
    %18 = vector.load %arg5[%c0_11, %c0_12] : memref<32x128xbf16, #tpu.memory_space<vmem>>, vector<32x128xbf16>
    %cst_13 = arith.constant dense<0.000000e+00> : vector<8x128xf32>
    %19 = tpu.matmul %13, %18, %cst_13 {dimension_numbers = #tpu.dot_dimension_numbers<[1], [0], [0], [1], [0, 0, 1, 1], [], []>} : vector<8x32xbf16>, vector<32x128xbf16>, vector<8x128xf32> -> vector<8x128xf32>
    %20 = arith.truncf %15 : vector<8x32xf32> to vector<8x32xbf16>
    %c0_14 = arith.constant 0 : index
    %c0_15 = arith.constant 0 : index
    %21 = vector.load %arg6[%c0_14, %c0_15] : memref<32x128xbf16, #tpu.memory_space<vmem>>, vector<32x128xbf16>
    %cst_16 = arith.constant dense<0.000000e+00> : vector<8x128xf32>
    %22 = tpu.matmul %20, %21, %cst_16 {dimension_numbers = #tpu.dot_dimension_numbers<[1], [0], [0], [1], [0, 0, 1, 1], [], []>} : vector<8x32xbf16>, vector<32x128xbf16>, vector<8x128xf32> -> vector<8x128xf32>
    %23 = arith.addf %19, %22 : vector<8x128xf32>
    %c0_17 = arith.constant 0 : index
    %c0_18 = arith.constant 0 : index
    %24 = vector.load %arg7[%c0_17, %c0_18] : memref<1x128xf32, #tpu.memory_space<vmem>>, vector<1x128xf32>
    %25 = vector.broadcast %24 : vector<1x128xf32> to vector<8x128xf32>
    %26 = arith.addf %23, %25 : vector<8x128xf32>
    %27 = arith.negf %26 : vector<8x128xf32>
    %28 = math.exp %27 : vector<8x128xf32>
    %cst_19 = arith.constant 1.000000e+00 : f32
    %29 = vector.broadcast %cst_19 : f32 to vector<8x128xf32>
    %30 = arith.addf %29, %28 : vector<8x128xf32>
    %31 = arith.divf %29, %30 : vector<8x128xf32>
    %32 = math.tanh %26 : vector<8x128xf32>
    %33 = vector.extract_strided_slice %31 {offsets = [0, 0], sizes = [8, 32], strides = [1, 1]} : vector<8x128xf32> to vector<8x32xf32>
    %34 = vector.extract_strided_slice %31 {offsets = [0, 32], sizes = [8, 32], strides = [1, 1]} : vector<8x128xf32> to vector<8x32xf32>
    %35 = vector.extract_strided_slice %32 {offsets = [0, 64], sizes = [8, 32], strides = [1, 1]} : vector<8x128xf32> to vector<8x32xf32>
    %36 = vector.extract_strided_slice %31 {offsets = [0, 96], sizes = [8, 32], strides = [1, 1]} : vector<8x128xf32> to vector<8x32xf32>
    %37 = arith.mulf %34, %17 : vector<8x32xf32>
    %38 = arith.mulf %33, %35 : vector<8x32xf32>
    %39 = arith.addf %37, %38 : vector<8x32xf32>
    %40 = math.tanh %39 : vector<8x32xf32>
    %41 = arith.mulf %36, %40 : vector<8x32xf32>
    %42 = arith.truncf %41 : vector<8x32xf32> to vector<8x32xbf16>
    %c1 = arith.constant 1 : index
    %c0_20 = arith.constant 0 : index
    %c0_21 = arith.constant 0 : index
    %43 = vector.load %arg16[%c1, %c0_20, %c0_21] : memref<2x8x32xf32, #tpu.memory_space<vmem>>, vector<1x8x32xf32>
    %44 = vector.shape_cast %43 : vector<1x8x32xf32> to vector<8x32xf32>
    %c1_22 = arith.constant 1 : index
    %c0_23 = arith.constant 0 : index
    %c0_24 = arith.constant 0 : index
    %45 = vector.load %arg17[%c1_22, %c0_23, %c0_24] : memref<2x8x32xf32, #tpu.memory_space<vmem>>, vector<1x8x32xf32>
    %46 = vector.shape_cast %45 : vector<1x8x32xf32> to vector<8x32xf32>
    %c0_25 = arith.constant 0 : index
    %c0_26 = arith.constant 0 : index
    %47 = vector.load %arg8[%c0_25, %c0_26] : memref<32x128xbf16, #tpu.memory_space<vmem>>, vector<32x128xbf16>
    %cst_27 = arith.constant dense<0.000000e+00> : vector<8x128xf32>
    %48 = tpu.matmul %42, %47, %cst_27 {dimension_numbers = #tpu.dot_dimension_numbers<[1], [0], [0], [1], [0, 0, 1, 1], [], []>} : vector<8x32xbf16>, vector<32x128xbf16>, vector<8x128xf32> -> vector<8x128xf32>
    %49 = arith.truncf %44 : vector<8x32xf32> to vector<8x32xbf16>
    %c0_28 = arith.constant 0 : index
    %c0_29 = arith.constant 0 : index
    %50 = vector.load %arg9[%c0_28, %c0_29] : memref<32x128xbf16, #tpu.memory_space<vmem>>, vector<32x128xbf16>
    %cst_30 = arith.constant dense<0.000000e+00> : vector<8x128xf32>
    %51 = tpu.matmul %49, %50, %cst_30 {dimension_numbers = #tpu.dot_dimension_numbers<[1], [0], [0], [1], [0, 0, 1, 1], [], []>} : vector<8x32xbf16>, vector<32x128xbf16>, vector<8x128xf32> -> vector<8x128xf32>
    %52 = arith.addf %48, %51 : vector<8x128xf32>
    %c0_31 = arith.constant 0 : index
    %c0_32 = arith.constant 0 : index
    %53 = vector.load %arg10[%c0_31, %c0_32] : memref<1x128xf32, #tpu.memory_space<vmem>>, vector<1x128xf32>
    %54 = vector.broadcast %53 : vector<1x128xf32> to vector<8x128xf32>
    %55 = arith.addf %52, %54 : vector<8x128xf32>
    %56 = arith.negf %55 : vector<8x128xf32>
    %57 = math.exp %56 : vector<8x128xf32>
    %cst_33 = arith.constant 1.000000e+00 : f32
    %58 = vector.broadcast %cst_33 : f32 to vector<8x128xf32>
    %59 = arith.addf %58, %57 : vector<8x128xf32>
    %60 = arith.divf %58, %59 : vector<8x128xf32>
    %61 = math.tanh %55 : vector<8x128xf32>
    %62 = vector.extract_strided_slice %60 {offsets = [0, 0], sizes = [8, 32], strides = [1, 1]} : vector<8x128xf32> to vector<8x32xf32>
    %63 = vector.extract_strided_slice %60 {offsets = [0, 32], sizes = [8, 32], strides = [1, 1]} : vector<8x128xf32> to vector<8x32xf32>
    %64 = vector.extract_strided_slice %61 {offsets = [0, 64], sizes = [8, 32], strides = [1, 1]} : vector<8x128xf32> to vector<8x32xf32>
    %65 = vector.extract_strided_slice %60 {offsets = [0, 96], sizes = [8, 32], strides = [1, 1]} : vector<8x128xf32> to vector<8x32xf32>
    %66 = arith.mulf %63, %46 : vector<8x32xf32>
    %67 = arith.mulf %62, %64 : vector<8x32xf32>
    %68 = arith.addf %66, %67 : vector<8x32xf32>
    %69 = math.tanh %68 : vector<8x32xf32>
    %70 = arith.mulf %65, %69 : vector<8x32xf32>
    %71 = arith.truncf %70 : vector<8x32xf32> to vector<8x32xbf16>
    %c0_34 = arith.constant 0 : index
    %c0_35 = arith.constant 0 : index
    %72 = vector.load %arg11[%c0_34, %c0_35] : memref<32x128xbf16, #tpu.memory_space<vmem>>, vector<32x128xbf16>
    %cst_36 = arith.constant dense<0.000000e+00> : vector<8x128xf32>
    %73 = tpu.matmul %71, %72, %cst_36 {dimension_numbers = #tpu.dot_dimension_numbers<[1], [0], [0], [1], [0, 0, 1, 1], [], []>} : vector<8x32xbf16>, vector<32x128xbf16>, vector<8x128xf32> -> vector<8x128xf32>
    %c0_37 = arith.constant 0 : index
    %c0_38 = arith.constant 0 : index
    %74 = vector.load %arg12[%c0_37, %c0_38] : memref<1x128xf32, #tpu.memory_space<vmem>>, vector<1x128xf32>
    %75 = vector.broadcast %74 : vector<1x128xf32> to vector<8x128xf32>
    %76 = arith.addf %73, %75 : vector<8x128xf32>
    %c0_39 = arith.constant 0 : index
    %c0_40 = arith.constant 0 : index
    %c0_41 = arith.constant 0 : index
    %77 = vector.load %arg13[%c0_39, %c0_40, %c0_41] : memref<1x8x128xf32, #tpu.memory_space<vmem>>, vector<1x8x128xf32>
    %78 = vector.shape_cast %77 : vector<1x8x128xf32> to vector<8x128xf32>
    %79 = vector.shape_cast %76 : vector<8x128xf32> to vector<1x8x128xf32>
    tpu.vector_store %arg13[%c0_39, %c0_40, %c0_41], %79 {strides = array<i32>} : memref<1x8x128xf32, #tpu.memory_space<vmem>>, vector<1x8x128xf32>,
    %c0_42 = arith.constant 0 : index
    %c0_43 = arith.constant 0 : index
    %c0_44 = arith.constant 0 : index
    %80 = vector.load %arg16[%c0_42, %c0_43, %c0_44] : memref<2x8x32xf32, #tpu.memory_space<vmem>>, vector<1x8x32xf32>
    %81 = vector.shape_cast %80 : vector<1x8x32xf32> to vector<8x32xf32>
    %82 = vector.shape_cast %41 : vector<8x32xf32> to vector<1x8x32xf32>
    tpu.vector_store %arg16[%c0_42, %c0_43, %c0_44], %82 {strides = array<i32>} : memref<2x8x32xf32, #tpu.memory_space<vmem>>, vector<1x8x32xf32>,
    %c1_45 = arith.constant 1 : index
    %c0_46 = arith.constant 0 : index
    %c0_47 = arith.constant 0 : index
    %83 = vector.load %arg16[%c1_45, %c0_46, %c0_47] : memref<2x8x32xf32, #tpu.memory_space<vmem>>, vector<1x8x32xf32>
    %84 = vector.shape_cast %83 : vector<1x8x32xf32> to vector<8x32xf32>
    %85 = vector.shape_cast %70 : vector<8x32xf32> to vector<1x8x32xf32>
    tpu.vector_store %arg16[%c1_45, %c0_46, %c0_47], %85 {strides = array<i32>} : memref<2x8x32xf32, #tpu.memory_space<vmem>>, vector<1x8x32xf32>,
    %c0_48 = arith.constant 0 : index
    %c0_49 = arith.constant 0 : index
    %c0_50 = arith.constant 0 : index
    %86 = vector.load %arg17[%c0_48, %c0_49, %c0_50] : memref<2x8x32xf32, #tpu.memory_space<vmem>>, vector<1x8x32xf32>
    %87 = vector.shape_cast %86 : vector<1x8x32xf32> to vector<8x32xf32>
    %88 = vector.shape_cast %39 : vector<8x32xf32> to vector<1x8x32xf32>
    tpu.vector_store %arg17[%c0_48, %c0_49, %c0_50], %88 {strides = array<i32>} : memref<2x8x32xf32, #tpu.memory_space<vmem>>, vector<1x8x32xf32>,
    %c1_51 = arith.constant 1 : index
    %c0_52 = arith.constant 0 : index
    %c0_53 = arith.constant 0 : index
    %89 = vector.load %arg17[%c1_51, %c0_52, %c0_53] : memref<2x8x32xf32, #tpu.memory_space<vmem>>, vector<1x8x32xf32>
    %90 = vector.shape_cast %89 : vector<1x8x32xf32> to vector<8x32xf32>
    %91 = vector.shape_cast %68 : vector<8x32xf32> to vector<1x8x32xf32>
    tpu.vector_store %arg17[%c1_51, %c0_52, %c0_53], %91 {strides = array<i32>} : memref<2x8x32xf32, #tpu.memory_space<vmem>>, vector<1x8x32xf32>,
    %c7_i32 = arith.constant 7 : i32
    %92 = arith.cmpi eq, %arg0, %c7_i32 : i32
    %93 = arith.extui %92 : i1 to i32
    %c0_i32_54 = arith.constant 0 : i32
    %94 = arith.cmpi ne, %93, %c0_i32_54 : i32
    scf.if %94 {
      %c0_55 = arith.constant 0 : index
      %c0_56 = arith.constant 0 : index
      %c0_57 = arith.constant 0 : index
      %95 = vector.load %arg16[%c0_55, %c0_56, %c0_57] : memref<2x8x32xf32, #tpu.memory_space<vmem>>, vector<2x8x32xf32>
      %c0_58 = arith.constant 0 : index
      %c0_59 = arith.constant 0 : index
      %c0_60 = arith.constant 0 : index
      %96 = vector.load %arg14[%c0_58, %c0_59, %c0_60] : memref<2x8x32xf32, #tpu.memory_space<vmem>>, vector<2x8x32xf32>
      tpu.vector_store %arg14[%c0_58, %c0_59, %c0_60], %95 {strides = array<i32>} : memref<2x8x32xf32, #tpu.memory_space<vmem>>, vector<2x8x32xf32>,
      %c0_61 = arith.constant 0 : index
      %c0_62 = arith.constant 0 : index
      %c0_63 = arith.constant 0 : index
      %97 = vector.load %arg17[%c0_61, %c0_62, %c0_63] : memref<2x8x32xf32, #tpu.memory_space<vmem>>, vector<2x8x32xf32>
      %c0_64 = arith.constant 0 : index
      %c0_65 = arith.constant 0 : index
      %c0_66 = arith.constant 0 : index
      %98 = vector.load %arg15[%c0_64, %c0_65, %c0_66] : memref<2x8x32xf32, #tpu.memory_space<vmem>>, vector<2x8x32xf32>
      tpu.vector_store %arg15[%c0_64, %c0_65, %c0_66], %97 {strides = array<i32>} : memref<2x8x32xf32, #tpu.memory_space<vmem>>, vector<2x8x32xf32>,
    } else {
    }
    return
  }
  func.func @transform_0(%arg0: i32) -> (i32, i32, i32) {
    %c0_i32 = arith.constant 0 : i32
    %c0_i32_0 = arith.constant 0 : i32
    %c0_i32_1 = arith.constant 0 : i32
    return %arg0, %c0_i32, %c0_i32_0 : i32, i32, i32
  }
  func.func @transform_1(%arg0: i32) -> (i32, i32, i32) {
    %c0_i32 = arith.constant 0 : i32
    %c0_i32_0 = arith.constant 0 : i32
    %c0_i32_1 = arith.constant 0 : i32
    %c0_i32_2 = arith.constant 0 : i32
    return %c0_i32, %c0_i32_0, %c0_i32_1 : i32, i32, i32
  }
  func.func @transform_2(%arg0: i32) -> (i32, i32, i32) {
    %c0_i32 = arith.constant 0 : i32
    %c0_i32_0 = arith.constant 0 : i32
    %c0_i32_1 = arith.constant 0 : i32
    %c0_i32_2 = arith.constant 0 : i32
    return %c0_i32, %c0_i32_0, %c0_i32_1 : i32, i32, i32
  }
  func.func @transform_3(%arg0: i32) -> (i32, i32) {
    %c0_i32 = arith.constant 0 : i32
    %c0_i32_0 = arith.constant 0 : i32
    %c0_i32_1 = arith.constant 0 : i32
    return %c0_i32, %c0_i32_0 : i32, i32
  }
  func.func @transform_4(%arg0: i32) -> (i32, i32) {
    %c0_i32 = arith.constant 0 : i32
    %c0_i32_0 = arith.constant 0 : i32
    %c0_i32_1 = arith.constant 0 : i32
    return %c0_i32, %c0_i32_0 : i32, i32
  }
  func.func @transform_5(%arg0: i32) -> (i32, i32) {
    %c0_i32 = arith.constant 0 : i32
    %c0_i32_0 = arith.constant 0 : i32
    %c0_i32_1 = arith.constant 0 : i32
    return %c0_i32, %c0_i32_0 : i32, i32
  }
  func.func @transform_6(%arg0: i32) -> (i32, i32) {
    %c0_i32 = arith.constant 0 : i32
    %c0_i32_0 = arith.constant 0 : i32
    %c0_i32_1 = arith.constant 0 : i32
    return %c0_i32, %c0_i32_0 : i32, i32
  }
  func.func @transform_7(%arg0: i32) -> (i32, i32) {
    %c0_i32 = arith.constant 0 : i32
    %c0_i32_0 = arith.constant 0 : i32
    %c0_i32_1 = arith.constant 0 : i32
    return %c0_i32, %c0_i32_0 : i32, i32
  }
  func.func @transform_8(%arg0: i32) -> (i32, i32) {
    %c0_i32 = arith.constant 0 : i32
    %c0_i32_0 = arith.constant 0 : i32
    %c0_i32_1 = arith.constant 0 : i32
    return %c0_i32, %c0_i32_0 : i32, i32
  }
  func.func @transform_9(%arg0: i32) -> (i32, i32) {
    %c0_i32 = arith.constant 0 : i32
    %c0_i32_0 = arith.constant 0 : i32
    %c0_i32_1 = arith.constant 0 : i32
    return %c0_i32, %c0_i32_0 : i32, i32
  }
  func.func @transform_10(%arg0: i32) -> (i32, i32) {
    %c0_i32 = arith.constant 0 : i32
    %c0_i32_0 = arith.constant 0 : i32
    %c0_i32_1 = arith.constant 0 : i32
    return %c0_i32, %c0_i32_0 : i32, i32
  }
  func.func @transform_11(%arg0: i32) -> (i32, i32) {
    %c0_i32 = arith.constant 0 : i32
    %c0_i32_0 = arith.constant 0 : i32
    %c0_i32_1 = arith.constant 0 : i32
    return %c0_i32, %c0_i32_0 : i32, i32
  }
  func.func @transform_12(%arg0: i32) -> (i32, i32, i32) {
    %c0_i32 = arith.constant 0 : i32
    %c0_i32_0 = arith.constant 0 : i32
    %c0_i32_1 = arith.constant 0 : i32
    return %arg0, %c0_i32, %c0_i32_0 : i32, i32, i32
  }
  func.func @transform_13(%arg0: i32) -> (i32, i32, i32) {
    %c0_i32 = arith.constant 0 : i32
    %c0_i32_0 = arith.constant 0 : i32
    %c0_i32_1 = arith.constant 0 : i32
    %c0_i32_2 = arith.constant 0 : i32
    return %c0_i32, %c0_i32_0, %c0_i32_1 : i32, i32, i32
  }
  func.func @transform_14(%arg0: i32) -> (i32, i32, i32) {
    %c0_i32 = arith.constant 0 : i32
    %c0_i32_0 = arith.constant 0 : i32
    %c0_i32_1 = arith.constant 0 : i32
    %c0_i32_2 = arith.constant 0 : i32
    return %c0_i32, %c0_i32_0, %c0_i32_1 : i32, i32, i32
  }
}

</mosaic_0001>

<bundles_post_ra>
// kernel: _decode_impl.1
= control target key start
LH: loop header
LB: loop body
LE: loop exit
PB: predicated region body
PF: predicated region fallthrough
CT: control target
= control target key end

     0   :  { %s1821_s0 = inlined_call_operand.vmem [shape: s32[8,8,1], index: 0, kind: input, shape index: {}]   ;;  %s1822_s1 = inlined_call_operand.vmem [shape: f32[2,8,32], index: 1, kind: input, shape index: {}]   ;;  %s1823_s2 = inlined_call_operand.vmem [shape: f32[2,8,32], index: 2, kind: input, shape index: {}]   ;;  %s1824_s3 = inlined_call_operand.vmem [shape: bf16[128,32], index: 3, kind: input, shape index: {}]   ;;  %s1825_s4 = inlined_call_operand.vmem [shape: bf16[32,128], index: 4, kind: input, shape index: {}]   ;;  %s1826_s5 = inlined_call_operand.vmem [shape: bf16[32,128], index: 5, kind: input, shape index: {}]   ;;  %s1827_s6 = inlined_call_operand.vmem [shape: f32[1,128], index: 6, kind: input, shape index: {}]   ;;  %s1828_s7 = inlined_call_operand.vmem [shape: bf16[32,128], index: 7, kind: input, shape index: {}]   ;;  %s1829_s8 = inlined_call_operand.vmem [shape: bf16[32,128], index: 8, kind: input, shape index: {}]   ;;  %s1830_s9 = inlined_call_operand.vmem [shape: f32[1,128], index: 9, kind: input, shape index: {}]   ;;  %s1831_s10 = inlined_call_operand.vmem [shape: bf16[32,128], index: 10, kind: input, shape index: {}]   ;;  %s1832_s11 = inlined_call_operand.vmem [shape: f32[1,128], index: 11, kind: input, shape index: {}]   ;;  %s1833_s12 = inlined_call_operand.hbm [shape: f32[8,8,128], index: 12, kind: output, shape index: {0}]   ;;  %s1834_s13 = inlined_call_operand.hbm [shape: f32[2,8,32], index: 13, kind: output, shape index: {1}]   ;;  %s1835_s14 = inlined_call_operand.hbm [shape: f32[2,8,32], index: 14, kind: output, shape index: {2}]  }
   0x1   :  { %1844 = sst [smem:[#allocation17_spill]] %s1821_s0 }
   0x2   :  { %1845 = sst [smem:[#allocation18_spill]] %s1822_s1 }
   0x3   :  { %1846 = sst [smem:[#allocation19_spill]] %s1823_s2 }
   0x4   :  { %1847 = sst [smem:[#allocation20_spill]] %s1824_s3 }
   0x5   :  { %20 = vsyncpa [#allocation5], 0 }
   0x6   :  { %22 = vsyncpa [#allocation5 + $0x1], 0 }
   0x7   :  { %23 = vsyncpa [#allocation7], 0  ;;  %s1561_s29 = smov 0   ;;  %s1563_s30 = smov 0  }
   0x8   :  { %s1565_s15 = smov 0   ;;  %s1567_s16 = smov 0  }
   0x9 LB: > { %1848 = sst [smem:[#allocation11_spill]] %s1460_s29  ;;  %s1582_s17 = sadd.s32 4294967295, %s1472_s16   ;;  %s1472_s16 = sphi %s1567_s16, %s1869_s16   ;;  %s1468_s15 = sphi %s1565_s15, %s1871_s15   ;;  %s1464_s30 = sphi %s1563_s30, %s1873_s30   ;;  %s1460_s29 = sphi %s1561_s29, %s1872_s29  }
   0xa   : > { %1849 = sst [smem:[#allocation12_spill]] %s1468_s15  ;;  %s1132_s18 = sadd.s32 4294967294, %s1472_s16  }
   0xb   : > { %1850 = sst [smem:[#allocation13_spill]] %s1472_s16  ;;  %s1586_s19 = sadd.s32 1, %s1472_s16  }
   0xc   : > { %1851 = sst [smem:[#allocation14_spill]] %s1586_s19  ;;  %s293_s20 = sadd.s32 1, %s1468_s15 }
   0xd   : > { %s290_s21 = ssub.s32 %s1472_s16, %s1586_s19  ;;  %p303_p0 = scmp.ne.s32.totalorder %s1468_s15, %s1464_s30 }
   0xe   : > { %p291_p1 = scmp.eq.s32.totalorder %s290_s21, 0  ;;  %p1843_p2 = scmp.eq.s32.totalorder %s1582_s17, 7 }
   0xf   : > { %p309_p3 = scmp.ne.s32.totalorder %s1464_s30, %s1460_s29  ;;  %p310_p4 = scmp.eq.s32.totalorder %s1132_s18, 7 }
  0x10   : > { %s1597_s22 = scalar_select %p291_p1, %s1468_s15, %s293_s20  }
  0x11   : > { %p1601_p5 = por %p1843_p2, %p303_p0  ;;  %p1605_p6 = por %p310_p4, %p309_p3 }
  0x12   : > { %1852 = sst [smem:[#allocation15_spill]] %s1597_s22  ;;  %p1135_p7 = scmp.ge.s32.totalorder %s1472_s16, 1 }
  0x13   : > { %s1854_s24 = scalar_select %p1605_p6, 1, 0 }
  0x14   : > { %p410_p8 = scmp.lt.s32.totalorder %s1472_s16, 9 }
  0x15   : > { %1855 = sst [smem:[#allocation16_spill]] %s1854_s24 }
  0x16   : > { %p411_p9 = pnand %p1135_p7, %p410_p8 }
  0x17   : > { %s1841_s25 = sand.u32 (!%p411_p9), 1, %s1464_s30   ;;  %p455_p10 = scmp.lt.s32.totalorder (!%p411_p9), %s1582_s17, 7 }
  0x18   : > { %414 = sbr.rel (%p411_p9) target bundleno = 2008 (0x7d8), region = 68  ;;  %s1615_s26 = sshll.u32 (!%p411_p9), %s1841_s25, 3 }
  0x19   : > { %s1856_s0 = sld [smem:[#allocation17_spill]] (!%p411_p9)  ;;  %s450_s22 = scalar_lea.vmem (!%p411_p9), [#allocation4], %s1615_s26 }
  0x1a   : > { %p1138_p11 = scmp.ne.s32.totalorder (!%p411_p9), %s1582_s17, 0 }
  0x1d   : > { %s456_s27 = scalar_select %p455_p10, %s1582_s17, 7 }
  0x1e   : > { %463 = sbr.rel (%p1138_p11) target bundleno = 39 (0x27), region = 72  ;;  %s1857_s1 = sld [smem:[#allocation18_spill]] (!%p1138_p11) }
  0x1f   : > { %s1137_s28 = sshll.u32 %s456_s27, 3  ;;  %s1858_s2 = sld [smem:[#allocation19_spill]] (!%p1138_p11) }
  0x20   : > { %s458_s21 = scalar_lea.vmem %s1856_s0, %s1137_s28 }
  0x23   : > { %vm466_vm0 = vcmask 261120  }
  0x24   : > { %v464_v0 = vld [vmem:[%s1857_s1] sm:$0xff]  ;;  %v465_v1 = vld [vmem:[%s1857_s1 + $0x8] sm:$0xff] }
  0x25   : > { %v469_v2 = vld [vmem:[%s1858_s2] sm:$0xff]  ;;  %467 = vst.msk [vmem:[#allocation2] sm:$0xff] %vm466_vm0, %v464_v0  ;;  %468 = vst.msk [vmem:[#allocation2 + $0x8] sm:$0xff] %vm466_vm0, %v465_v1  ;;  %v470_v3 = vld [vmem:[%s1858_s2 + $0x8] sm:$0xff] }
  0x26   : > { %471 = vst.msk [vmem:[#allocation3] sm:$0xff] %vm466_vm0, %v469_v2  ;;  %472 = vst.msk [vmem:[#allocation3 + $0x8] sm:$0xff] %vm466_vm0, %v470_v3 }
  0x27 PF: > { %v473_v4 = vld [vmem:[%s458_s21] sm:$0xff]  ;;  %s1859_s3 = sld [smem:[#allocation20_spill]]  ;;  %v1474_v6 = vmov 0   ;;  %v1475_v7 = vmov 0.0   ;;  %vm1476_vm1 = vmmov 0   ;;  %v1334_v11 = vld [vmem:[%s1826_s5 + $0x8] sm:$0xff]   ;;  %v474_v21 = vlaneseq }
  0x28   : > { %1325 = vset.pattern.permute.xlu0 %v1474_v6  ;;  %1203 = vmatprep.subr.bf16.mxu0 %v1475_v7  ;;  %v1335_v12 = vld [vmem:[%s1826_s5] sm:$0xff]   ;;  %vm611_vm2 = vcmask 261120   ;;  %v1336_v15 = vld [vmem:[%s1825_s4 + $0x8] sm:$0xff]   ;;  %v1477_v24 = vmov 1.0|1.0   ;;  %s1478_s29 = smov 32  }
  0x29   : > { %477 = vperm.xlu0 %1325, %v473_v4   ;;  %1223 = vmatprep.subr.bf16.mxu1 %v1475_v7  ;;  %v1337_v18 = vld [vmem:[%s1825_s4] sm:$0xff]   ;;  %v475_v22 = vand.u32 127, %v474_v21  ;;  %s1479_s25 = smov 64   ;;  %v1338_v53 = vld [vmem:[%s1829_s8 + $0x8] sm:$0xff]   ;;  %s1480_s15 = smov 96  }
  0x2a   : > { %1219 = vmatprep.mubr.msk.bf16.mxu0 %vm1476_vm1, %v1475_v7  ;;  %1227 = vmatprep.mubr.msk.bf16.mxu1 %vm1476_vm1, %v1475_v7  ;;  %v1156_v36 = vld [vmem:[%s1827_s6] ss:$0 sm:$0xff]  ;;  %v1340_v57 = vld [vmem:[%s1828_s7 + $0x8] sm:$0xff]   ;;  %p1170_p12 = scmp.ne.s32.totalorder %s1582_s17, 7 }
  0x2b   : > { %1224 = vmatpush3.bf16.msra.mxu1 %v1334_v11  ;;  %v1339_v54 = vld [vmem:[%s1829_s8] sm:$0xff]  }
  0x2c   : > { %v588_v13 = vld [vmem:[#allocation2] sm:$0xff]  ;;  %1225 = vmatprep.subr.bf16.mxu1 %v1475_v7  ;;  %v748_v55 = vld [vmem:[#allocation2 + $0x8] sm:$0xff] }
  0x2d   : > { %v1326_v5 = vld [vmem:[%s1859_s3 + $0x38] sm:$0xff]   ;;  %v1327_v8 = vld [vmem:[%s1859_s3 + $0x30] sm:$0xff]   ;;  %v1328_v9 = vld [vmem:[%s1859_s3 + $0x28] sm:$0xff]   ;;  %v594_v16 = vpack.c.bf16 %v588_v13, %v588_v13  ;;  %v755_v56 = vpack.c.bf16 %v748_v55, %v748_v55 }
  0x2e   : > { %1204 = vmatpush3.bf16.msra.mxu0 %v1326_v5  ;;  %v1329_v10 = vld [vmem:[%s1859_s3 + $0x20] sm:$0xff]   ;;  %v1330_v14 = vld [vmem:[%s1859_s3 + $0x18] sm:$0xff]   ;;  %v1331_v17 = vld [vmem:[%s1859_s3 + $0x10] sm:$0xff]  }
  0x2f   : > { %1205 = vmatprep.subr.bf16.mxu0 %v1475_v7  ;;  %1226 = vmatpush3.bf16.msra.mxu1 %v1335_v12  ;;  %v1332_v19 = vld [vmem:[%s1859_s3 + $0x8] sm:$0xff]   ;;  %v1333_v20 = vld [vmem:[%s1859_s3] sm:$0xff]   ;;  %v589_v25 = vld [vmem:[#allocation3] sm:$0xff] }
  0x30   : > { %1231 = vmatprep.subr.bf16.mxu1 %v1475_v7  ;;  %726 = vrot.lane.b32.xlu1 %v589_v25, %s1478_s29  ;;  %v1341_v59 = vld [vmem:[%s1828_s7] sm:$0xff]   ;;  %v750_v63 = vld [vmem:[#allocation3 + $0x8] sm:$0xff]  ;;  %v1342_v25 = vld [vmem:[%s1831_s10 + $0x8] sm:$0xff]  }
  0x31   : > { %v1164_v6 = vld [vmem:[%s1830_s9] ss:$0 sm:$0xff] }
  0x32   : > { %1206 = vmatpush3.bf16.msra.mxu0 %v1327_v8  ;;  %1228 = vmatmul.mubr.msk.bf16.vlgmr.msra.gmra.mxu1 %vm611_vm2, %v594_v16 }
  0x33   : > { %1207 = vmatprep.subr.bf16.mxu0 %v1475_v7  ;;  %1232 = vmatpush3.bf16.msra.mxu1 %v1336_v15 }
  0x34   : > { %1233 = vmatprep.subr.bf16.mxu1 %v1475_v7  ;;  %1235 = vmatprep.mubr.msk.bf16.mxu1 %vm1476_vm1, %v1475_v7 }
  0x36   : > { %1208 = vmatpush3.bf16.msra.mxu0 %v1328_v9 }
  0x37   : > { %1209 = vmatprep.subr.bf16.mxu0 %v1475_v7  ;;  %1234 = vmatpush3.bf16.msra.mxu1 %v1337_v18 }
  0x38   : > { %1239 = vmatprep.subr.bf16.mxu1 %v1475_v7 }
  0x3a   : > { %1210 = vmatpush3.bf16.msra.mxu0 %v1329_v10 }
  0x3b   : > { %1211 = vmatprep.subr.bf16.mxu0 %v1475_v7 }
  0x3e   : > { %1212 = vmatpush3.bf16.msra.mxu0 %v1330_v14 }
  0x3f   : > { %1213 = vmatprep.subr.bf16.mxu0 %v1475_v7 }
  0x42   : > { %1214 = vmatpush3.bf16.msra.mxu0 %v1331_v17 }
  0x43   : > { %1215 = vmatprep.subr.bf16.mxu0 %v1475_v7 }
  0x46   : > { %1216 = vmatpush3.bf16.msra.mxu0 %v1332_v19 }
  0x47   : > { %1217 = vmatprep.subr.bf16.mxu0 %v1475_v7 }
  0x4a   : > { %1218 = vmatpush3.bf16.msra.mxu0 %v1333_v20 }
  0x4b   : > { %1255 = vmatprep.subr.bf16.mxu0 %v1475_v7 }
  0xa2   : > { %v727_v49 = vpop.permute.xlu1 %726 }
  0xa4   : > { %v478_v23 = vpop.permute.xlu0 %477 }
  0xa5   : > { %vm479_vm3 = vcmp.eq.s32.totalorder %v475_v22, %v478_v23 }
  0xa6   : > { %vm1148_vm4 = vmpackc.low %vm479_vm3, %vm479_vm3 }
  0xa7   : > { %1220 = vmatmul.mubr.msk.bf16.vlgmr.msra.gmra.mxu0 %vm1148_vm4, %v1477_v24 }
  0xa8   : > { %1259 = vmatprep.mubr.msk.bf16.mxu0 %vm1476_vm1, %v1475_v7  ;;  %1256 = vmatpush3.bf16.msra.mxu0 %v1342_v25 }
  0xa9   : > { %1257 = vmatprep.subr.bf16.mxu0 %v1475_v7 }
  0xf2   : > { %v649_v26 = vpop.f32.mrf.mxu1 }
  0xf4   : > { %v1229_v27 = vpop.f32.mrf.mxu1 }
  0xf6   : > { %v652_v28 = vpop.f32.mrf.mxu1 }
  0xf8   : > { %v1230_v29 = vpop.f32.mrf.mxu1 }
 0x167   : > { %v581_v30 = vpop.f32.mrf.mxu0 }
 0x168   : > { %v587_v31 = vpack.c.bf16 %v581_v30, %v581_v30 }
 0x169   : > { %v1221_v32 = vpop.f32.mrf.mxu0 }
 0x16a   : > { %1236 = vmatmul.mubr.msk.bf16.vlgmr.msra.gmra.mxu1 %vm611_vm2, %v587_v31 }
 0x16b   : > { %v584_v33 = vpop.f32.mrf.mxu0  ;;  %1243 = vmatprep.mubr.msk.bf16.mxu1 %vm1476_vm1, %v1475_v7  ;;  %1240 = vmatpush3.bf16.msra.mxu1 %v1338_v53 }
 0x16c   : > { %1241 = vmatprep.subr.bf16.mxu1 %v1475_v7 }
 0x16d   : > { %v1222_v34 = vpop.f32.mrf.mxu0 }
 0x16e   : > { %v1166_v34 = vld [vmem:[%s1832_s11] ss:$0 sm:$0xff] }
 0x16f   : > { %1242 = vmatpush3.bf16.msra.mxu1 %v1339_v54 }
 0x170   : > { %1247 = vmatprep.subr.bf16.mxu1 %v1475_v7 }
 0x172   : > { %1244 = vmatmul.mubr.msk.bf16.vlgmr.msra.gmra.mxu1 %vm611_vm2, %v755_v56 }
 0x173   : > { %1248 = vmatpush3.bf16.msra.mxu1 %v1340_v57  ;;  %1251 = vmatprep.mubr.msk.bf16.mxu1 %vm1476_vm1, %v1475_v7 }
 0x174   : > { %1249 = vmatprep.subr.bf16.mxu1 %v1475_v7 }
 0x177   : > { %1250 = vmatpush3.bf16.msra.mxu1 %v1341_v59 }
 0x22a   : > { %v704_v35 = vpop.f32.mrf.mxu1 }
 0x22b   : > { %v705_v37 = vadd.f32 %v704_v35, %v649_v26  ;;  %v1343_v26 = vld [vmem:[%s1831_s10] sm:$0xff]  }
 0x22c   : > { %v1237_v38 = vpop.f32.mrf.mxu1  ;;  %1258 = vmatpush3.bf16.msra.mxu0 %v1343_v26 }
 0x22d   : > { %v717_v39 = vadd.f32 %v1156_v36, %v705_v37 }
 0x22e   : > { %v707_v40 = vpop.f32.mrf.mxu1 }
 0x22f   : > { %1344 = vtanh.f32 %v717_v39  ;;  %v1157_v43 = vmul.f32 -1.442695, %v717_v39 }
 0x230   : > { %v1238_v41 = vpop.f32.mrf.mxu1 }
 0x231   : > { %1346 = vpow2.f32 %v1157_v43 }
 0x232   : > { %v809_v0 = vpop.f32.mrf.mxu1 }
 0x234   : > { %v1245_v1 = vpop.f32.mrf.mxu1 }
 0x236   : > { %v812_v2 = vpop.f32.mrf.mxu1 }
 0x238   : > { %v1246_v3 = vpop.f32.mrf.mxu1 }
 0x23c   : > { %v1345_v42 = vpop.eup %1344 }
 0x23d   : > { %731 = vrot.lane.b32.xlu0 %v1345_v42, %s1479_s25 }
 0x23e   : > { %v1347_v44 = vpop.eup %1346 }
 0x23f   : > { %v721_v45 = vadd.f32 1.0, %v1347_v44 }
 0x241   : > { %1348 = vrcp.f32 %v721_v45 }
 0x24e   : > { %v1349_v46 = vpop.eup %1348 }
 0x24f   : > { %v729_v50 = vmul.f32 %v1349_v46, %v727_v49 }
 0x2af   : > { %v732_v47 = vpop.permute.xlu0 %731 }
 0x2b0   : > { %v734_v48 = vmul.f32 %v1349_v46, %v732_v47 }
 0x2b2   : > { %736 = vrot.lane.b32.xlu1 %v734_v48, %s1478_s29 }
 0x324   : > { %v737_v51 = vpop.permute.xlu1 %736 }
 0x325   : > { %v1703_v52 = vadd.f32 %v737_v51, %v729_v50 }
 0x327   : > { %1350 = vtanh.f32 %v1703_v52 }
 0x334   : > { %v1351_v58 = vpop.eup %1350 }
 0x335   : > { %742 = vrot.lane.b32.xlu0 %v1351_v58, %s1479_s25 }
 0x3a7   : > { %v743_v60 = vpop.permute.xlu0 %742 }
 0x3a8   : > { %v745_v61 = vmul.f32 %v1349_v46, %v743_v60 }
 0x3aa   : > { %v746_v62 = vpack.c.bf16 %v745_v61, %v745_v61 }
 0x3ac   : > { %816 = vrot.lane.b32.xlu1 %v746_v62, %s1478_s29 }
 0x3b0   : > { %889 = vrot.lane.b32.xlu1 %v750_v63, %s1478_s29 }
 0x41e   : > { %v817_v4 = vpop.permute.xlu1 %816 }
 0x41f   : > { %1252 = vmatmul.mubr.msk.bf16.vlgmr.msra.gmra.mxu1 %vm611_vm2, %v817_v4 }
 0x422   : > { %v890_v20 = vpop.permute.xlu1 %889 }
 0x4df   : > { %v867_v5 = vpop.f32.mrf.mxu1 }
 0x4e0   : > { %v868_v8 = vadd.f32 %v867_v5, %v809_v0 }
 0x4e1   : > { %v1253_v9 = vpop.f32.mrf.mxu1 }
 0x4e2   : > { %v880_v10 = vadd.f32 %v1164_v6, %v868_v8 }
 0x4e3   : > { %v870_v11 = vpop.f32.mrf.mxu1 }
 0x4e4   : > { %1352 = vtanh.f32 %v880_v10  ;;  %v1165_v14 = vmul.f32 -1.442695, %v880_v10 }
 0x4e5   : > { %v1254_v12 = vpop.f32.mrf.mxu1 }
 0x4e6   : > { %1354 = vpow2.f32 %v1165_v14 }
 0x4f1   : > { %v1353_v13 = vpop.eup %1352 }
 0x4f2   : > { %894 = vrot.lane.b32.xlu0 %v1353_v13, %s1479_s25 }
 0x4f3   : > { %v1355_v15 = vpop.eup %1354 }
 0x4f4   : > { %v884_v16 = vadd.f32 1.0, %v1355_v15 }
 0x4f6   : > { %1356 = vrcp.f32 %v884_v16 }
 0x503   : > { %v1357_v17 = vpop.eup %1356 }
 0x504   : > { %v892_v21 = vmul.f32 %v1357_v17, %v890_v20 }
 0x564   : > { %v895_v18 = vpop.permute.xlu0 %894 }
 0x565   : > { %v897_v19 = vmul.f32 %v1357_v17, %v895_v18 }
 0x567   : > { %899 = vrot.lane.b32.xlu0 %v897_v19, %s1478_s29 }
 0x5d9   : > { %v900_v22 = vpop.permute.xlu0 %899 }
 0x5da   : > { %v902_v23 = vadd.f32 %v900_v22, %v892_v21 }
 0x5dc   : > { %1358 = vtanh.f32 %v902_v23 }
 0x5e9   : > { %v1359_v24 = vpop.eup %1358 }
 0x5ea   : > { %905 = vrot.lane.b32.xlu1 %v1359_v24, %s1479_s25 }
 0x5ee   : > { %981 = vrot.lane.b32.xlu1 %v745_v61, %s1478_s29 }
 0x5f2   : > { %991 = vrot.lane.b32.xlu1 %v1703_v52, %s1480_s15 }
 0x65c   : > { %v906_v27 = vpop.permute.xlu1 %905 }
 0x65d   : > { %v908_v28 = vmul.f32 %v1357_v17, %v906_v27 }
 0x65f   : > { %v909_v29 = vpack.c.bf16 %v908_v28, %v908_v28 }
 0x660   : > { %v982_v30 = vpop.permute.xlu1 %981 }
 0x661   : > { %984 = vst.msk [vmem:[#allocation2] sm:$0xff] %vm611_vm2, %v982_v30  ;;  %922 = vrot.lane.b32.xlu0 %v909_v29, %s1478_s29 }
 0x664   : > { %v992_v31 = vpop.permute.xlu1 %991 }
 0x665   : > { %994 = vst.msk [vmem:[#allocation3] sm:$0xff] %vm611_vm2, %v992_v31  ;;  %986 = vrot.lane.b32.xlu0 %v908_v28, %s1478_s29 }
 0x669   : > { %996 = vrot.lane.b32.xlu0 %v902_v23, %s1480_s15 }
 0x6d3   : > { %v923_v7 = vpop.permute.xlu0 %922 }
 0x6d4   : > { %1260 = vmatmul.mubr.msk.bf16.vlgmr.msra.gmra.mxu0 %vm611_vm2, %v923_v7 }
 0x6d7   : > { %v987_v32 = vpop.permute.xlu0 %986 }
 0x6d8   : > { %989 = vst.msk [vmem:[#allocation2 + $0x8] sm:$0xff] %vm611_vm2, %v987_v32 }
 0x6db   : > { %v997_v33 = vpop.permute.xlu0 %996 }
 0x6dc   : > { %999 = vst.msk [vmem:[#allocation3 + $0x8] sm:$0xff] %vm611_vm2, %v997_v33 }
 0x794   : > { %v973_v35 = vpop.f32.mrf.mxu0 }
 0x795   : > { %v974_v36 = vadd.f32 %v1166_v34, %v973_v35 }
 0x796   : > { %v1261_v37 = vpop.f32.mrf.mxu0  ;;  %1003 = sbr.rel (%p1170_p12) target bundleno = 1950 (0x79e), region = 76 }
 0x797   : > { %979 = vst [vmem:[%s450_s22] sm:$0xff] %v974_v36 }
 0x798   : > { %v976_v38 = vpop.f32.mrf.mxu0 }
 0x79a   : > { %v1262_v39 = vpop.f32.mrf.mxu0 }
 0x79b   : > { %v1004_v40 = vld [vmem:[#allocation2] sm:$0xff]  ;;  %v1005_v41 = vld [vmem:[#allocation2 + $0x8] sm:$0xff]  ;;  %v1008_v42 = vld [vmem:[#allocation3] sm:$0xff] }
 0x79c   : > { %1006 = vst.msk [vmem:[#allocation6] sm:$0xff] %vm611_vm2, %v1004_v40  ;;  %1007 = vst.msk [vmem:[#allocation6 + $0x8] sm:$0xff] %vm611_vm2, %v1005_v41  ;;  %v1009_v43 = vld [vmem:[#allocation3 + $0x8] sm:$0xff] }
 0x79d   : > { %1010 = vst.msk [vmem:[#allocation8] sm:$0xff] %vm611_vm2, %v1008_v42  ;;  %1011 = vst.msk [vmem:[#allocation8 + $0x8] sm:$0xff] %vm611_vm2, %v1009_v43 }
 0x79e PF: > { %s1481_s29 = smov [#allocation6]  }
 0x79f   : > { %s1036_s16 = sshll.u32 %s1481_s29, 4  ;;  %s1037_s16 = int_to_ptr.vmem [resolvable:$true] %s1036_s16 }
 0x7a0   : > { %s1360_s24 = scalar_lea.vmem %s1037_s16, 256  ;;  %p1367_p3 = scmp.lt.s32.totalorder %s1037_s16, %s1037_s16 }
 0x7a1   : > { %p1361_p13 = scmp.ne.s32.totalorder %s1037_s16, %s1360_s24  ;;  %p1368_p4 = scmp.lt.s32.totalorder %s1360_s24, %s1360_s24 }
 0x7a3   : > { %p1362_p0 = pnand %p1361_p13, %p1843_p2  ;;  %p1369_p7 = por %p1368_p4, %p1367_p3 }
 0x7a5   : > { %p1363_p1 = pneg %p1362_p0 }
 0x7a7   : > { %p1370_p8 = pnand %p1369_p7, %p1363_p1 }
 0x7a9   : > { %1373 = shalt.err (!%p1370_p8)
}
 0x7aa   : > { %s1482_s18 = smov 128   ;;  %s1483_s20 = smov 8  }
 0x7ab   : > { %1265 = dma.vmem_to_hbm [thread:$0]  (%p1843_p2), %s1037_s16, 256, %s1834_s13, [#allocation7], %s1482_s18, %s1482_s18, %s1483_s20  }
 0x7ac   : > { %s1172_s28 = sshll.u32 %s1582_s17, 7  ;;  %s1026_s15 = sshll.u32 %s450_s22, 4  ;;  %s1027_s15 = int_to_ptr.vmem [resolvable:$true] %s1026_s15 }
 0x7ad   : > { %s1024_s29 = scalar_lea.hbm %s1833_s12, %s1172_s28  ;;  %s1860_s24 = sand.u32 1, %s1464_s30  }
 0x7ae   : > { %s1013_s0 = scalar_lea.sflag [#allocation5], %s1860_s24  ;;  %s1384_s1 = scalar_lea.vmem %s1027_s15, 128 }
 0x7af   : > { %p1385_p9 = scmp.ne.s32.totalorder %s1027_s15, %s1384_s1  ;;  %s1484_s2 = smov [#allocation4]  }
 0x7b0   : > { %s1388_s3 = sshll.u32 %s1484_s2, 4  ;;  %s1389_s3 = int_to_ptr.vmem [resolvable:$false] %s1388_s3 }
 0x7b1   : > { %p1386_p10 = pnand %p1385_p9, %p1601_p5  ;;  %s1390_s21 = scalar_lea.vmem %s1389_s3, 256 }
 0x7b2   : > { %p1391_p12 = scmp.lt.s32.totalorder %s1027_s15, %s1389_s3  ;;  %p1392_p13 = scmp.lt.s32.totalorder %s1390_s21, %s1384_s1 }
 0x7b3   : > { %p1387_p11 = pneg %p1386_p10 }
 0x7b4   : > { %p1393_p0 = por %p1392_p13, %p1391_p12 }
 0x7b6   : > { %p1394_p1 = pnand %p1393_p0, %p1387_p11 }
 0x7b8   : > { %1397 = shalt.err (!%p1394_p1)
}
 0x7b9   : > { %s1398_s22 = scalar_lea.hbm %s1024_s29, 128  ;;  %s1402_s27 = scalar_lea.hbm %s1833_s12, 1024 }
 0x7ba   : > { %p1399_p3 = scmp.ne.s32.totalorder %s1024_s29, %s1398_s22  ;;  %p1403_p8 = scmp.lt.s32.totalorder %s1024_s29, %s1833_s12 }
 0x7bb   : > { %p1404_p9 = scmp.lt.s32.totalorder %s1402_s27, %s1398_s22 }
 0x7bc   : > { %p1400_p4 = pnand %p1399_p3, %p1601_p5 }
 0x7bd   : > { %p1405_p10 = por %p1404_p9, %p1403_p8 }
 0x7be   : > { %p1401_p7 = pneg %p1400_p4 }
 0x7c0   : > { %p1406_p2 = pnand %p1405_p10, %p1401_p7 }
 0x7c2   : > { %1409 = shalt.err (!%p1406_p2)
}
 0x7c3   : > { %1263 = dma.vmem_to_hbm [thread:$0]  (%p1601_p5), %s1027_s15, 128, %s1024_s29, %s1013_s0  }
 0x7c4   : > { %s1485_s1 = smov [#allocation8]   ;;  %p1861_p12 = scmp.eq.s32.totalorder %s1582_s17, 7 }
 0x7c5   : > { %s1049_s2 = sshll.u32 %s1485_s1, 4  ;;  %s1050_s2 = int_to_ptr.vmem [resolvable:$true] %s1049_s2 }
 0x7c6   : > { %s1410_s3 = scalar_lea.vmem %s1050_s2, 256  ;;  %p1417_p1 = scmp.lt.s32.totalorder %s1050_s2, %s1050_s2 }
 0x7c7   : > { %p1411_p11 = scmp.ne.s32.totalorder %s1050_s2, %s1410_s3  ;;  %p1418_p3 = scmp.lt.s32.totalorder %s1410_s3, %s1410_s3 }
 0x7c9   : > { %p1412_p13 = pnand %p1411_p11, %p1861_p12  ;;  %p1419_p4 = por %p1418_p3, %p1417_p1 }
 0x7cb   : > { %p1413_p0 = pneg %p1412_p13 }
 0x7cd   : > { %p1420_p6 = pnand %p1419_p4, %p1413_p0 }
 0x7cf   : > { %1423 = shalt.err (!%p1420_p6)
}
 0x7d0   : > { %p1862_p7 = pmov %p1861_p12 }
 0x7d2   : > { %1267 = dma.vmem_to_hbm [thread:$0]  (%p1862_p7), %s1050_s2, 256, %s1835_s14, [#allocation7], %s1482_s18, %s1482_s18, %s1483_s20  }
 0x7d3   : > { %p1863_p2 = pmov %p1862_p7 }
 0x7d5   : > { %1451 = dma.done.wait (%p1863_p2), [#allocation7], 512   ;;  %p1864_p5 = pmov %p1863_p2 }
 0x7d7   : > { %1453 = vsyncadd (%p1864_p5), [#allocation7], 4294966784 }
 0x7d8 PF: > { %s1865_s15 = sld [smem:[#allocation13_spill]] }
 0x7d9   : > { %s1866_s19 = sld [smem:[#allocation11_spill]] }
 0x7da   : > { %s1867_s29 = sld [smem:[#allocation16_spill]] }
 0x7de   : > { %p1281_p6 = scmp.ge.s32.totalorder %s1865_s15, 2 }
 0x7df   : > { %s1072_s24 = sand.u32 1, %s1866_s19  }
 0x7e0   : > { %p1868_p8 = scmp.ne.s32.totalorder %s1867_s29, 0  ;;  %s1073_s21 = scalar_lea.sflag [#allocation5], %s1072_s24 }
 0x7e2   : > { %p1274_p9 = pnand %p1281_p6, %p1868_p8 }
 0x7e4   : > { %p1275_p10 = pneg %p1274_p9 }
 0x7e6   : > { %1455 = dma.done.wait (%p1275_p10), %s1073_s21, 128  }
 0x7e7   : > { %1457 = vsyncadd (%p1275_p10), %s1073_s21, 4294967168  ;;  %s1869_s16 = sld [smem:[#allocation14_spill]]  ;;  %s1872_s29 = smov %s1464_s30 }
 0x7e8   : > { %s1870_s18 = sld [smem:[#allocation12_spill]] }
 0x7e9   : > { %s1871_s15 = sld [smem:[#allocation15_spill]] }
 0x7ed   : > { %p26_p11 = scmp.ge.s32.totalorder %s1869_s16, 10  }
 0x7ee   : > { %s1873_s30 = smov %s1870_s18 }
 0x7ef   :  { %28 = sbr.rel (!%p26_p11) target bundleno = 9 (0x9), region = 129 }
 0x7f4   :  { %1078 = vsyncpa [#allocation5], 1 }
 0x7f5   :  { %1080 = vsyncpa [#allocation5 + $0x1], 1 }
 0x7f6   :  { %1081 = vsyncpa [#allocation7], 1 }

</bundles_post_ra>
